<compile_context>
chip_gen: v7x
topology: tpu7x:2x2x1
jax: 0.10.0
libtpu: 0.0.40
codegen_flags: <defaults>
</compile_context>

<pallas_src>
import functools

import numpy as np
import jax
import jax.numpy as jnp
from jax.experimental import pallas as pl
from jax.experimental.pallas import tpu as pltpu


# ---------------------------------------------------------------------------
# Host-side: fold conv weights + zero-padding edge masks into a dense operator.
# ---------------------------------------------------------------------------
def _build_conv_operator(weight, H, W, K):
    """Returns T of shape (2, H*W, H*W) f32 such that, for a flattened map m_c (HW,),
    (m_0 @ T[0] + m_1 @ T[1])[h*W + w] equals PyTorch Conv2d(2, 1, K, padding=K//2)
    applied to the 2-channel map (cross-correlation, zero padding)."""
    pad = K // 2
    HW = H * W
    wt = np.asarray(weight, dtype=np.float32).reshape(2, K, K)
    T = np.zeros((2, HW, HW), dtype=np.float32)

    hh = np.arange(H)[:, None]              # output row  (H, 1)
    ww = np.arange(W)[None, :]              # output col  (1, W)
    dst = (hh * W + ww).reshape(-1)         # (HW,)
    for kh in range(K):
        for kw in range(K):
            sh = hh + (kh - pad)
            sw = ww + (kw - pad)
            valid = ((sh >= 0) & (sh < H) & (sw >= 0) & (sw < W)).reshape(-1)
            src = (np.clip(sh, 0, H - 1) * W + np.clip(sw, 0, W - 1)).reshape(-1)
            s, d = src[valid], dst[valid]
            T[0, s, d] += wt[0, kh, kw]     # taps feeding the max map
            T[1, s, d] += wt[1, kh, kw]     # taps feeding the avg map
    return jnp.asarray(T)


# ---------------------------------------------------------------------------
# Kernel: one batch tile.
# ---------------------------------------------------------------------------
def _spatial_attention_kernel(x_ref, t_ref, b_ref, o_ref, *, C):
    """
    x_ref : VMEM (Bt, C, HW)   input, native dtype
    t_ref : VMEM (2, HW, HW)   f32 masked-weight conv operator (0=max map, 1=avg map)
    b_ref : SMEM (1,)          f32 conv bias
    o_ref : VMEM (Bt, HW)      output (size-1 channel dim squeezed by the BlockSpec)
    """
    x = x_ref[...]                                                  # native dtype
    max_r = jnp.max(x, axis=1).astype(jnp.float32)                  # (Bt, HW)
    avg_r = jnp.sum(x, axis=1, dtype=jnp.float32) * (1.0 / C)       # (Bt, HW) f32 acc

    # Whole 7x7 conv (weights + edge masks already folded into T) on the MXU.
    conv = (jnp.dot(max_r, t_ref[0], preferred_element_type=jnp.float32)
            + jnp.dot(avg_r, t_ref[1], preferred_element_type=jnp.float32)
            + b_ref[0])                                             # (Bt, HW)

    o_ref[...] = jax.nn.sigmoid(conv).astype(o_ref.dtype)


# ---------------------------------------------------------------------------
# Wrapper.
# ---------------------------------------------------------------------------
def _choose_batch_tile(B, per_batch_bytes, budget_bytes):
    bt = max(1, min(B, budget_bytes // max(per_batch_bytes, 1)))
    if B >= 2:                      # >=2 grid steps: megacore sharding + DMA overlap
        bt = min(bt, pl.cdiv(B, 2))
    if B >= 16 and bt >= 8:         # full 8-sublane vregs for the per-map temps
        bt = (bt // 8) * 8
    while B % bt:                   # exact divisor of B -> no ragged last block
        bt -= 1
    return int(bt)


def spatial_attention(x, weight, bias, kernel_size=7,
                      vmem_budget_bytes=16 * 1024 * 1024):
    """x: (B, C, H, W); weight: (1, 2, K, K); bias: (1,) -> (B, 1, H, W) in x.dtype."""
    B, C, H, W = x.shape
    K = kernel_size
    HW = H * W
    assert HW % 128 == 0, "lane-dense path expects H*W to be a multiple of 128"

    T = _build_conv_operator(weight, H, W, K)              # (2, HW, HW) f32
    b_flat = jnp.asarray(bias, jnp.float32).reshape(-1)    # (1,)
    x2 = x.reshape(B, C, HW)                               # free reshape, native dtype

    # --- VMEM accounting (per batch row) -> batch tile + compiler limit ---
    in_item = jnp.dtype(x.dtype).itemsize
    per_batch = (2 * C * HW * in_item      # double-buffered input block
                 + 2 * HW * in_item        # double-buffered output block
                 + 8 * HW * 4)             # f32 temps: max/avg/conv/sigmoid slack
    t_bytes = 2 * T.size * 4               # conv operator, double-buffered
    bt = _choose_batch_tile(B, per_batch,
                            max(vmem_budget_bytes - t_bytes, per_batch))
    grid = B // bt
    vmem_limit = int(min(max(bt * per_batch + t_bytes + (4 << 20), 16 << 20),
                         64 << 20))

    kernel = functools.partial(_spatial_attention_kernel, C=C)

    out = pl.pallas_call(
        kernel,
        out_shape=jax.ShapeDtypeStruct((B, 1, HW), x.dtype),
        grid_spec=pltpu.PrefetchScalarGridSpec(
            num_scalar_prefetch=0,
            grid=(grid,),
            in_specs=[
                pl.BlockSpec((bt, C, HW), lambda b: (b, 0, 0)),
                pl.BlockSpec((2, HW, HW), lambda b: (0, 0, 0)),
                pl.BlockSpec(memory_space=pltpu.MemorySpace.SMEM),
            ],
            # Size-1 channel dim squeezed -> kernel stores a lane-dense (bt, HW) tile.
            out_specs=pl.BlockSpec((bt, None, HW), lambda b: (b, 0, 0)),
        ),
        compiler_params=pltpu.CompilerParams(
            dimension_semantics=("parallel",),     # batch steps independent
            vmem_limit_bytes=vmem_limit),
    )(x2, T, b_flat)

    return out.reshape(B, 1, H, W)


# ---------------------------------------------------------------------------
# Pure-JAX reference (matches the PyTorch forward).
# ---------------------------------------------------------------------------
def spatial_attention_reference(x, weight, bias):
    pad = weight.shape[-1] // 2
    max_r = jnp.max(x, axis=1, keepdims=True)
    avg_r = jnp.mean(x, axis=1, keepdims=True)
    r = jnp.concatenate([max_r, avg_r], axis=1)
    out = jax.lax.conv_general_dilated(
        r, weight, window_strides=(1, 1), padding=[(pad, pad), (pad, pad)],
        dimension_numbers=("NCHW", "OIHW", "NCHW"),
        precision=jax.lax.Precision.HIGHEST)
    return jax.nn.sigmoid(out + bias.reshape(1, 1, 1, 1))


if __name__ == "__main__":
    key = jax.random.PRNGKey(0)
    kx, kw, kb = jax.random.split(key, 3)

    B, C, H, W = 2, 4, 16, 16
    K = 7

    x = jax.random.normal(kx, (B, C, H, W), dtype=jnp.float32)

    # Deterministic Conv2d(2, 1, 7, padding=3) init (PyTorch-style uniform bound).
    fan_in = 2 * K * K
    bound = 1.0 / (fan_in ** 0.5)
    weight = jax.random.uniform(kw, (1, 2, K, K), jnp.float32, -bound, bound)
    bias = jax.random.uniform(kb, (1,), jnp.float32, -bound, bound)

    out = spatial_attention(x, weight, bias, kernel_size=K)
    out = jax.block_until_ready(out)

    ref = spatial_attention_reference(x, weight, bias)
    assert out.shape == (B, 1, H, W)
    err = float(jnp.max(jnp.abs(out - ref)))
    assert err < 1e-5, f"max err {err}"

    print("KERNEL_OK")
</pallas_src>

<mosaic_0001>
module attributes {stable_mosaic.version = 11 : i64} {
  func.func @_spatial_attention_kernel(%arg0: i32, %arg1: memref<1x4x256xf32, #tpu.memory_space<vmem>>, %arg2: memref<2x256x256xf32, #tpu.memory_space<vmem>>, %arg3: memref<1xf32, #tpu.memory_space<smem>>, %arg4: memref<1x1x256xf32, #tpu.memory_space<vmem>>) attributes {dimension_semantics = [#tpu.dimension_semantics<parallel>], iteration_bounds = array<i64: 2>, scalar_prefetch = 0 : i64, scratch_operands = 0 : i64, tpu.core_type = #tpu.core_type<tc>, window_params = [{transform_indices = @transform_0, window_bounds = array<i64: 1, 4, 256>}, {pipeline_mode = #tpu.pipeline_mode<synchronous>, transform_indices = @transform_1, window_bounds = array<i64: 2, 256, 256>}, {transform_indices = @transform_2, window_bounds = array<i64: 1>}, {transform_indices = @transform_3, window_bounds = array<i64: 1, 1, 256>}]} {
    %c0 = arith.constant 0 : index
    %c0_0 = arith.constant 0 : index
    %c0_1 = arith.constant 0 : index
    %0 = vector.load %arg1[%c0, %c0_0, %c0_1] : memref<1x4x256xf32, #tpu.memory_space<vmem>>, vector<1x4x256xf32>
    %cst = arith.constant dense<0xFF800000> : vector<1x256xf32>
    %1 = vector.multi_reduction <maximumf>, %0, %cst [1] : vector<1x4x256xf32> to vector<1x256xf32>
    %cst_2 = arith.constant dense<0.000000e+00> : vector<1x256xf32>
    %2 = vector.multi_reduction <add>, %0, %cst_2 [1] : vector<1x4x256xf32> to vector<1x256xf32>
    %cst_3 = arith.constant 2.500000e-01 : f32
    %3 = vector.broadcast %cst_3 : f32 to vector<1x256xf32>
    %4 = arith.mulf %2, %3 : vector<1x256xf32>
    %c0_4 = arith.constant 0 : index
    %c0_5 = arith.constant 0 : index
    %c0_6 = arith.constant 0 : index
    %5 = vector.load %arg2[%c0_4, %c0_5, %c0_6] : memref<2x256x256xf32, #tpu.memory_space<vmem>>, vector<1x256x256xf32>
    %6 = vector.shape_cast %5 : vector<1x256x256xf32> to vector<256x256xf32>
    %cst_7 = arith.constant dense<0.000000e+00> : vector<1x256xf32>
    %7 = tpu.matmul %1, %6, %cst_7 {dimension_numbers = #tpu.dot_dimension_numbers<[1], [0], [0], [1], [0, 0, 1, 1], [], []>} : vector<1x256xf32>, vector<256x256xf32>, vector<1x256xf32> -> vector<1x256xf32>
    %c1 = arith.constant 1 : index
    %c0_8 = arith.constant 0 : index
    %c0_9 = arith.constant 0 : index
    %8 = vector.load %arg2[%c1, %c0_8, %c0_9] : memref<2x256x256xf32, #tpu.memory_space<vmem>>, vector<1x256x256xf32>
    %9 = vector.shape_cast %8 : vector<1x256x256xf32> to vector<256x256xf32>
    %cst_10 = arith.constant dense<0.000000e+00> : vector<1x256xf32>
    %10 = tpu.matmul %4, %9, %cst_10 {dimension_numbers = #tpu.dot_dimension_numbers<[1], [0], [0], [1], [0, 0, 1, 1], [], []>} : vector<1x256xf32>, vector<256x256xf32>, vector<1x256xf32> -> vector<1x256xf32>
    %11 = arith.addf %7, %10 : vector<1x256xf32>
    %c0_11 = arith.constant 0 : index
    %12 = memref.load %arg3[%c0_11] : memref<1xf32, #tpu.memory_space<smem>>
    %13 = vector.broadcast %12 : f32 to vector<1x256xf32>
    %14 = arith.addf %11, %13 : vector<1x256xf32>
    %15 = arith.negf %14 : vector<1x256xf32>
    %16 = math.exp %15 : vector<1x256xf32>
    %cst_12 = arith.constant 1.000000e+00 : f32
    %17 = vector.broadcast %cst_12 : f32 to vector<1x256xf32>
    %18 = arith.addf %17, %16 : vector<1x256xf32>
    %19 = arith.divf %17, %18 : vector<1x256xf32>
    %c0_13 = arith.constant 0 : index
    %c0_14 = arith.constant 0 : index
    %c0_15 = arith.constant 0 : index
    %20 = vector.load %arg4[%c0_13, %c0_14, %c0_15] : memref<1x1x256xf32, #tpu.memory_space<vmem>>, vector<1x1x256xf32>
    %21 = vector.shape_cast %20 : vector<1x1x256xf32> to vector<1x256xf32>
    %22 = vector.shape_cast %19 : vector<1x256xf32> to vector<1x1x256xf32>
    tpu.vector_store %arg4[%c0_13, %c0_14, %c0_15], %22 {strides = array<i32>} : memref<1x1x256xf32, #tpu.memory_space<vmem>>, vector<1x1x256xf32>,
    return
  }
  func.func @transform_0(%arg0: i32) -> (i32, i32, i32) {
    %c0_i32 = arith.constant 0 : i32
    %c0_i32_0 = arith.constant 0 : i32
    %c0_i32_1 = arith.constant 0 : i32
    return %arg0, %c0_i32, %c0_i32_0 : i32, i32, i32
  }
  func.func @transform_1(%arg0: i32) -> (i32, i32, i32) {
    %c0_i32 = arith.constant 0 : i32
    %c0_i32_0 = arith.constant 0 : i32
    %c0_i32_1 = arith.constant 0 : i32
    %c0_i32_2 = arith.constant 0 : i32
    return %c0_i32, %c0_i32_0, %c0_i32_1 : i32, i32, i32
  }
  func.func @transform_2(%arg0: i32) -> i32 {
    %c0_i32 = arith.constant 0 : i32
    %c0_i32_0 = arith.constant 0 : i32
    return %c0_i32 : i32
  }
  func.func @transform_3(%arg0: i32) -> (i32, i32, i32) {
    %c0_i32 = arith.constant 0 : i32
    %c0_i32_0 = arith.constant 0 : i32
    %c0_i32_1 = arith.constant 0 : i32
    return %arg0, %c0_i32, %c0_i32_0 : i32, i32, i32
  }
}

</mosaic_0001>

<bundles_post_ra>
// kernel: tpu_custom_call.1
= control target key start
LH: loop header
LB: loop body
LE: loop exit
PB: predicated region body
PF: predicated region fallthrough
CT: control target
= control target key end

     0   :  { %s1225_s0 = inlined_call_operand.hbm [shape: f32[2,4,256], index: 0, kind: input, shape index: {}]   ;;  %s1226_s1 = inlined_call_operand.hbm [shape: f32[2,256,256], index: 1, kind: input, shape index: {}]   ;;  %s1227_s2 = inlined_call_operand.<no memory space> [shape: f32[1], index: 2, kind: input, shape index: {}]   ;;  %s1228_s3 = inlined_call_operand.hbm [shape: f32[2,1,256], index: 3, kind: output, shape index: {}]  }
   0x1   :  { %8 = sst [smem:[#allocation2]] %s1227_s2 }
   0x2   :  { %9 = vsyncpa [#allocation4], 0 }
   0x3   :  { %11 = vsyncpa [#allocation4 + $0x1], 0 }
   0x4   :  { %12 = vsyncpa [#allocation7], 0 }
   0x5   :  { %13 = vsyncpa [#allocation5], 0 }
   0x6   :  { %15 = vsyncpa [#allocation5 + $0x1], 0  ;;  %s1021_s14 = smov 0   ;;  %s1023_s15 = smov 0  }
   0x7   :  { %s1025_s16 = smov 0   ;;  %s1027_s17 = smov 0  }
   0x8 LB: > { %s1042_s2 = sadd.s32 4294967295, %s990_s17   ;;  %s643_s18 = sadd.s32 4294967294, %s990_s17   ;;  %s990_s17 = sphi %s1027_s17, %s1248_s17   ;;  %s986_s16 = sphi %s1025_s16, %s1247_s16   ;;  %s982_s15 = sphi %s1023_s15, %s1246_s15   ;;  %s978_s14 = sphi %s1021_s14, %s1245_s14  }
   0x9   : > { %p41_p0 = scmp.ne.s32.totalorder %s982_s15, %s978_s14  ;;  %p1229_p1 = scmp.eq.s32.totalorder %s1042_s2, 0 }
   0xa   : > { %p113_p3 = scmp.eq.s32.totalorder %s643_s18, 1  ;;  %p644_p5 = scmp.ge.s32.totalorder %s990_s17, 1 }
   0xb   : > { %p1051_p4 = por %p1229_p1, %p41_p0  ;;  %p120_p7 = scmp.lt.s32.totalorder %s990_s17, 3 }
   0xc   : > { %p1056_p6 = por %p113_p3, %p41_p0  ;;  %s992_s22 = smov [#allocation6]  }
   0xd   : > { %s1232_s19 = scalar_select %p1051_p4, 1, 0 }
   0xe   : > { %s1233_s20 = scalar_select %p1056_p6, 1, 0 }
   0xf   : > { %p1061_p8 = pnand %p644_p5, %p120_p7  ;;  %s132_s23 = sshll.u32 %s992_s22, 4  ;;  %s1065_s23 = int_to_ptr.vmem [resolvable:$true] %s132_s23 }
  0x10   : > { %s1077_s25 = sadd.s32 1, %s990_s17   ;;  %s28_s26 = sadd.s32 1, %s986_s16 }
  0x11   : > { %s1234_s21 = scalar_select %p1061_p8, 1, 0 }
  0x12   : > { %p801_p9 = pneg %p1061_p8  ;;  %s25_s27 = ssub.s32 %s990_s17, %s1077_s25 }
  0x13   : > { %s862_s30 = scalar_lea.hbm %s1226_s1, 16384 }
  0x14   : > { %p1072_p11 = pnand %p801_p9, %p1229_p1  ;;  %p863_p12 = scmp.ne.s32.totalorder %s1226_s1, %s862_s30 }
  0x15   : > { %p869_p5 = scmp.lt.u32.totalorder %s862_s30, %s1226_s1 }
  0x16   : > { %p864_p13 = pneg %p1072_p11 }
  0x18   : > { %p865_p0 = pnand %p864_p13, %p863_p12 }
  0x1a   : > { %p866_p3 = pneg %p865_p0 }
  0x1c   : > { %p871_p7 = pnand %p869_p5, %p866_p3 }
  0x1e   : > { %874 = shalt.err (!%p871_p7)
}
  0x1f   : > { %s875_s8 = scalar_lea.vmem %s1065_s23, 16384  ;;  %p883_p2 = scmp.lt.s32.totalorder %s1065_s23, %s1065_s23 }
  0x20   : > { %p876_p9 = scmp.ne.s32.totalorder %s1065_s23, %s875_s8  ;;  %p884_p6 = scmp.lt.s32.totalorder %s875_s8, %s875_s8 }
  0x22   : > { %p878_p10 = pnand %p876_p9, %p864_p13  ;;  %p885_p4 = por %p884_p6, %p883_p2 }
  0x24   : > { %p879_p1 = pneg %p878_p10 }
  0x26   : > { %p886_p8 = pnand %p885_p4, %p879_p1 }
  0x28   : > { %889 = shalt.err (!%p886_p8)
}
  0x29   : > { %s993_s9 = smov 256   ;;  %s994_s10 = smov 16  }
  0x2a   : > { %804 = dma.hbm_to_vmem [thread:$0]  (!%p1072_p11), %s1226_s1, 16384, %s1065_s23, [#allocation7], %s993_s9, %s993_s9, %s994_s10  }
  0x2b   : > { %p26_p2 = scmp.eq.s32.totalorder %s25_s27, 0  ;;  %p35_p1 = scmp.ne.s32.totalorder %s986_s16, %s982_s15 }
  0x2c   : > { %p36_p4 = scmp.eq.s32.totalorder %s990_s17, 0  ;;  %p814_p6 = scmp.lt.s32.totalorder %s990_s17, 2 }
  0x2d   : > { %s1108_s13 = scalar_select %p26_p2, %s986_s16, %s28_s26  }
  0x2e   : > { %p37_p8 = por %p36_p4, %p35_p1  ;;  %p1236_p10 = scmp.eq.s32.totalorder %s1042_s2, 1 }
  0x2f   : > { %s149_s22 = sand.u32 1, %s986_s16   ;;  %s661_s28 = sshll.u32 %s990_s17, 7 }
  0x30   : > { %p1112_p12 = por %p1236_p10, %p35_p1  ;;  %s647_s29 = sshll.u32 %s149_s22, 3 }
  0x31   : > { %s1121_s4 = scalar_lea.hbm %s1225_s0, %s661_s28  ;;  %s153_s23 = scalar_lea.vmem [#allocation3], %s647_s29 }
  0x32   : > { %s161_s26 = sshll.u32 %s153_s23, 4  ;;  %p1123_p11 = pnand %p814_p6, %p37_p8  ;;  %s1127_s26 = int_to_ptr.vmem [resolvable:$true] %s161_s26 }
  0x33   : > { %s150_s5 = scalar_lea.sflag [#allocation4], %s149_s22  ;;  %s890_s6 = scalar_lea.hbm %s1121_s4, 128 }
  0x34   : > { %p891_p13 = scmp.ne.s32.totalorder %s1121_s4, %s890_s6  ;;  %p892_p0 = pneg %p1123_p11 }
  0x35   : > { %s895_s9 = scalar_lea.hbm %s1225_s0, 256  ;;  %p896_p7 = scmp.lt.u32.totalorder %s1121_s4, %s1225_s0 }
  0x36   : > { %p893_p3 = pnand %p892_p0, %p891_p13  ;;  %p897_p9 = scmp.lt.u32.totalorder %s895_s9, %s890_s6 }
  0x37   : > { %p899_p1 = scmp.lt.u32.totalorder %s890_s6, %s1121_s4 }
  0x38   : > { %p894_p5 = pneg %p893_p3  ;;  %p898_p2 = por %p897_p9, %p896_p7 }
  0x3a   : > { %p900_p4 = por %p899_p1, %p898_p2 }
  0x3c   : > { %p901_p6 = pnand %p900_p4, %p894_p5 }
  0x3e   : > { %904 = shalt.err (!%p901_p6)
}
  0x3f   : > { %s905_s12 = scalar_lea.vmem %s1127_s26, 128  ;;  %s995_s22 = smov [#allocation3]  }
  0x40   : > { %p906_p8 = scmp.ne.s32.totalorder %s1127_s26, %s905_s12  ;;  %s910_s28 = sshll.u32 %s995_s22, 4  ;;  %s911_s28 = int_to_ptr.vmem [resolvable:$false] %s910_s28 }
  0x41   : > { %s912_s29 = scalar_lea.vmem %s911_s28, 256  ;;  %p913_p3 = scmp.lt.s32.totalorder %s1127_s26, %s911_s28 }
  0x42   : > { %p908_p10 = pnand %p906_p8, %p892_p0  ;;  %p914_p7 = scmp.lt.s32.totalorder %s912_s29, %s905_s12 }
  0x44   : > { %p909_p13 = pneg %p908_p10  ;;  %p915_p9 = por %p914_p7, %p913_p3 }
  0x46   : > { %p916_p2 = pnand %p915_p9, %p909_p13 }
  0x48   : > { %919 = shalt.err (!%p916_p2)
}
  0x49   : > { %808 = dma.hbm_to_vmem [thread:$0]  (!%p1123_p11), %s1121_s4, 128, %s1127_s26, %s150_s5  }
  0x4a   : > { %p1239_p5 = scmp.ne.s32.totalorder %s1234_s21, 0 }
  0x4b   : > { %s1157_s24 = sand.u32 (!%p1239_p5), 1, %s982_s15   ;;  %p1240_p0 = scmp.ne.s32.totalorder (!%p1239_p5), %s1232_s19, 0 }
  0x4c   : > { %170 = sbr.rel (%p1239_p5) target bundleno = 419 (0x1a3), region = 32  ;;  %s651_s30 = sshll.u32 (!%p1239_p5), %s1157_s24, 3 }
  0x4d   : > { %s173_s23 = scalar_lea.sflag (!%p1239_p5), [#allocation4], %s1157_s24  ;;  %s1161_s6 = scalar_lea.vmem (!%p1239_p5), [#allocation3], %s651_s30 }
  0x53   : > { %965 = dma.done.wait (%p1240_p0), %s173_s23, 128  }
  0x54   : > { %967 = vsyncadd (%p1240_p0), %s173_s23, 4294967168  ;;  %p1241_p11 = scmp.eq.s32.totalorder %s1042_s2, 0 }
  0x56   : > { %969 = dma.done.wait (%p1241_p11), [#allocation7], 16384   ;;  %p1242_p1 = pmov %p1241_p11 }
  0x57   : > { %v304_v0 = vld [vmem:[#allocation6 + $0x208] sm:$0xff]  ;;  %v306_v1 = vld [vmem:[#allocation6 + $0x218] sm:$0xff]  ;;  %v303_v5 = vld [vmem:[#allocation6 + $0x200] sm:$0xff]  ;;  %vm207_vm0 = vcmask 1043456   ;;  %s509_s19 = sld [smem:[#allocation2]]  ;;  %s653_s21 = sshll.u32 %s1157_s24, 1 }
  0x58   : > { %971 = vsyncadd (%p1242_p1), [#allocation7], 4294950912  ;;  %v239_v2 = vld [vmem:[#allocation6 + $0x8] sm:$0xff]  ;;  %v663_v3 = vpack.c.bf16 %v306_v1, %v304_v0  ;;  %v241_v4 = vld [vmem:[#allocation6 + $0x18] sm:$0xff]  ;;  %s662_s4 = sshll.u32 %s1042_s2, 5  ;;  %s202_s26 = scalar_lea.vmem [#allocation8], %s653_s21 }
  0x59   : > { %v305_v6 = vld [vmem:[#allocation6 + $0x210] sm:$0xff]  ;;  %v727_v7 = vpack.c.bf16 %v241_v4, %v239_v2  ;;  %v238_v9 = vld [vmem:[#allocation6] sm:$0xff]  ;;  %v308_v11 = vld [vmem:[#allocation6 + $0x228] sm:$0xff]  ;;  %s563_s27 = sshll.u32 %s202_s26, 4  ;;  %s1181_s8 = scalar_lea.hbm %s1228_s3, %s662_s4  ;;  %s1183_s27 = int_to_ptr.vmem [resolvable:$true] %s563_s27 }
  0x5a   : > { %v665_v8 = vpack.c.bf16 %v305_v6, %v303_v5  ;;  %v240_v10 = vld [vmem:[#allocation6 + $0x10] sm:$0xff]  ;;  %664 = vmatprep.subr.bf16.mxu1 %v663_v3  ;;  %v310_v13 = vld [vmem:[#allocation6 + $0x238] sm:$0xff]  ;;  %v243_v14 = vld [vmem:[#allocation6 + $0x28] sm:$0xff]  ;;  %s549_s9 = scalar_lea.sflag [#allocation5], %s1157_s24  ;;  %s920_s10 = scalar_lea.vmem %s1183_s27, 32 }
  0x5b   : > { %v729_v12 = vpack.c.bf16 %v240_v10, %v238_v9  ;;  %v245_v15 = vld [vmem:[#allocation6 + $0x38] sm:$0xff]  ;;  %728 = vmatprep.subr.bf16.mxu0 %v727_v7  ;;  %v667_v16 = vpack.c.bf16 %v310_v13, %v308_v11  ;;  %v307_v18 = vld [vmem:[#allocation6 + $0x220] sm:$0xff]  ;;  %v309_v19 = vld [vmem:[#allocation6 + $0x230] sm:$0xff]  ;;  %p921_p4 = scmp.ne.s32.totalorder %s1183_s27, %s920_s10  ;;  %s997_s2 = smov [#allocation8]  }
  0x5c   : > { %666 = vmatpush1.bf16.msra.mxu1 %v665_v8  ;;  %v731_v17 = vpack.c.bf16 %v245_v15, %v243_v14  ;;  %v242_v20 = vld [vmem:[#allocation6 + $0x20] sm:$0xff]  ;;  %v669_v21 = vpack.c.bf16 %v309_v19, %v307_v18  ;;  %v244_v22 = vld [vmem:[#allocation6 + $0x30] sm:$0xff]  ;;  %v312_v23 = vld [vmem:[#allocation6 + $0x248] sm:$0xff]  ;;  %s924_s11 = sshll.u32 %s997_s2, 4  ;;  %s925_s11 = int_to_ptr.vmem [resolvable:$false] %s924_s11 }
  0x5d   : > { %730 = vmatpush1.bf16.msra.mxu0 %v729_v12  ;;  %v314_v24 = vld [vmem:[#allocation6 + $0x258] sm:$0xff]  ;;  %668 = vmatprep.subr.bf16.mxu1 %v667_v16  ;;  %v733_v25 = vpack.c.bf16 %v244_v22, %v242_v20  ;;  %v247_v27 = vld [vmem:[#allocation6 + $0x48] sm:$0xff]  ;;  %v311_v29 = vld [vmem:[#allocation6 + $0x240] sm:$0xff]  ;;  %p922_p6 = pnand %p921_p4, %p1112_p12  ;;  %s926_s12 = scalar_lea.vmem %s925_s11, 64 }
  0x5e   : > { %732 = vmatprep.subr.bf16.mxu0 %v731_v17  ;;  %v671_v26 = vpack.c.bf16 %v314_v24, %v312_v23  ;;  %v249_v28 = vld [vmem:[#allocation6 + $0x58] sm:$0xff]  ;;  %v313_v31 = vld [vmem:[#allocation6 + $0x250] sm:$0xff]  ;;  %v246_v32 = vld [vmem:[#allocation6 + $0x40] sm:$0xff]  ;;  %p927_p10 = scmp.lt.s32.totalorder %s1183_s27, %s925_s11  ;;  %p928_p13 = scmp.lt.s32.totalorder %s926_s12, %s920_s10 }
  0x5f   : > { %v735_v30 = vpack.c.bf16 %v249_v28, %v247_v27  ;;  %v248_v33 = vld [vmem:[#allocation6 + $0x50] sm:$0xff]  ;;  %v673_v34 = vpack.c.bf16 %v313_v31, %v311_v29  ;;  %v316_v35 = vld [vmem:[#allocation6 + $0x268] sm:$0xff]  ;;  %v318_v36 = vld [vmem:[#allocation6 + $0x278] sm:$0xff]  ;;  %p923_p8 = pneg %p922_p6 }
  0x60   : > { %670 = vmatpush1.bf16.msra.mxu1 %v669_v21  ;;  %v251_v37 = vld [vmem:[#allocation6 + $0x68] sm:$0xff]  ;;  %v737_v38 = vpack.c.bf16 %v248_v33, %v246_v32  ;;  %v675_v39 = vpack.c.bf16 %v318_v36, %v316_v35  ;;  %v253_v40 = vld [vmem:[#allocation6 + $0x78] sm:$0xff]  ;;  %v315_v41 = vld [vmem:[#allocation6 + $0x260] sm:$0xff]  ;;  %p929_p3 = por %p928_p13, %p927_p10 }
  0x61   : > { %734 = vmatpush1.bf16.msra.mxu0 %v733_v25  ;;  %672 = vmatprep.subr.bf16.mxu1 %v671_v26  ;;  %v317_v42 = vld [vmem:[#allocation6 + $0x270] sm:$0xff]  ;;  %v739_v43 = vpack.c.bf16 %v253_v40, %v251_v37  ;;  %v250_v44 = vld [vmem:[#allocation6 + $0x60] sm:$0xff]  ;;  %v320_v46 = vld [vmem:[#allocation6 + $0x288] sm:$0xff] }
  0x62   : > { %736 = vmatprep.subr.bf16.mxu0 %v735_v30  ;;  %v252_v45 = vld [vmem:[#allocation6 + $0x70] sm:$0xff]  ;;  %v322_v47 = vld [vmem:[#allocation6 + $0x298] sm:$0xff]  ;;  %v255_v48 = vld [vmem:[#allocation6 + $0x88] sm:$0xff]  ;;  %v677_v50 = vpack.c.bf16 %v317_v42, %v315_v41  ;;  %p930_p7 = pnand %p929_p3, %p923_p8 }
  0x63   : > { %v257_v49 = vld [vmem:[#allocation6 + $0x98] sm:$0xff]  ;;  %v741_v51 = vpack.c.bf16 %v252_v45, %v250_v44  ;;  %v679_v52 = vpack.c.bf16 %v322_v47, %v320_v46  ;;  %v319_v53 = vld [vmem:[#allocation6 + $0x280] sm:$0xff]  ;;  %v321_v54 = vld [vmem:[#allocation6 + $0x290] sm:$0xff] }
  0x64   : > { %674 = vmatpush1.bf16.msra.mxu1 %v673_v34  ;;  %v254_v55 = vld [vmem:[#allocation6 + $0x80] sm:$0xff]  ;;  %v743_v56 = vpack.c.bf16 %v257_v49, %v255_v48  ;;  %v256_v57 = vld [vmem:[#allocation6 + $0x90] sm:$0xff]  ;;  %v324_v58 = vld [vmem:[#allocation6 + $0x2a8] sm:$0xff]  ;;  %v681_v62 = vpack.c.bf16 %v321_v54, %v319_v53 }
  0x65   : > { %738 = vmatpush1.bf16.msra.mxu0 %v737_v38  ;;  %676 = vmatprep.subr.bf16.mxu1 %v675_v39  ;;  %v326_v59 = vld [vmem:[#allocation6 + $0x2b8] sm:$0xff]  ;;  %v259_v60 = vld [vmem:[#allocation6 + $0xa8] sm:$0xff]  ;;  %v745_v63 = vpack.c.bf16 %v256_v57, %v254_v55  ;;  %v323_v1 = vld [vmem:[#allocation6 + $0x2a0] sm:$0xff] }
  0x66   : > { %740 = vmatprep.subr.bf16.mxu0 %v739_v43  ;;  %v261_v61 = vld [vmem:[#allocation6 + $0xb8] sm:$0xff]  ;;  %v683_v0 = vpack.c.bf16 %v326_v59, %v324_v58  ;;  %v325_v2 = vld [vmem:[#allocation6 + $0x2b0] sm:$0xff]  ;;  %v258_v3 = vld [vmem:[#allocation6 + $0xa0] sm:$0xff] }
  0x67   : > { %v747_v4 = vpack.c.bf16 %v261_v61, %v259_v60  ;;  %v260_v5 = vld [vmem:[#allocation6 + $0xb0] sm:$0xff]  ;;  %v328_v6 = vld [vmem:[#allocation6 + $0x2c8] sm:$0xff]  ;;  %v330_v7 = vld [vmem:[#allocation6 + $0x2d8] sm:$0xff]  ;;  %v685_v10 = vpack.c.bf16 %v325_v2, %v323_v1 }
  0x68   : > { %678 = vmatpush1.bf16.msra.mxu1 %v677_v50  ;;  %v263_v8 = vld [vmem:[#allocation6 + $0xc8] sm:$0xff]  ;;  %v265_v9 = vld [vmem:[#allocation6 + $0xd8] sm:$0xff]  ;;  %v749_v11 = vpack.c.bf16 %v260_v5, %v258_v3  ;;  %v687_v12 = vpack.c.bf16 %v330_v7, %v328_v6  ;;  %v327_v13 = vld [vmem:[#allocation6 + $0x2c0] sm:$0xff] }
  0x69   : > { %742 = vmatpush1.bf16.msra.mxu0 %v741_v51  ;;  %680 = vmatprep.subr.bf16.mxu1 %v679_v52  ;;  %v329_v14 = vld [vmem:[#allocation6 + $0x2d0] sm:$0xff]  ;;  %v262_v15 = vld [vmem:[#allocation6 + $0xc0] sm:$0xff]  ;;  %v751_v16 = vpack.c.bf16 %v265_v9, %v263_v8  ;;  %v332_v18 = vld [vmem:[#allocation6 + $0x2e8] sm:$0xff] }
  0x6a   : > { %744 = vmatprep.subr.bf16.mxu0 %v743_v56  ;;  %v264_v17 = vld [vmem:[#allocation6 + $0xd0] sm:$0xff]  ;;  %v334_v19 = vld [vmem:[#allocation6 + $0x2f8] sm:$0xff]  ;;  %v267_v20 = vld [vmem:[#allocation6 + $0xe8] sm:$0xff]  ;;  %v689_v22 = vpack.c.bf16 %v329_v14, %v327_v13 }
  0x6b   : > { %v269_v21 = vld [vmem:[#allocation6 + $0xf8] sm:$0xff]  ;;  %v753_v23 = vpack.c.bf16 %v264_v17, %v262_v15  ;;  %v691_v24 = vpack.c.bf16 %v334_v19, %v332_v18  ;;  %v331_v25 = vld [vmem:[#allocation6 + $0x2e0] sm:$0xff]  ;;  %v333_v26 = vld [vmem:[#allocation6 + $0x2f0] sm:$0xff] }
  0x6c   : > { %682 = vmatpush1.bf16.msra.mxu1 %v681_v62  ;;  %v266_v27 = vld [vmem:[#allocation6 + $0xe0] sm:$0xff]  ;;  %v755_v28 = vpack.c.bf16 %v269_v21, %v267_v20  ;;  %v268_v29 = vld [vmem:[#allocation6 + $0xf0] sm:$0xff]  ;;  %v336_v30 = vld [vmem:[#allocation6 + $0x308] sm:$0xff]  ;;  %v693_v34 = vpack.c.bf16 %v333_v26, %v331_v25 }
  0x6d   : > { %746 = vmatpush1.bf16.msra.mxu0 %v745_v63  ;;  %684 = vmatprep.subr.bf16.mxu1 %v683_v0  ;;  %v338_v31 = vld [vmem:[#allocation6 + $0x318] sm:$0xff]  ;;  %v271_v32 = vld [vmem:[#allocation6 + $0x108] sm:$0xff]  ;;  %v757_v35 = vpack.c.bf16 %v268_v29, %v266_v27  ;;  %v335_v37 = vld [vmem:[#allocation6 + $0x300] sm:$0xff] }
  0x6e   : > { %748 = vmatprep.subr.bf16.mxu0 %v747_v4  ;;  %v273_v33 = vld [vmem:[#allocation6 + $0x118] sm:$0xff]  ;;  %v695_v36 = vpack.c.bf16 %v338_v31, %v336_v30  ;;  %v337_v38 = vld [vmem:[#allocation6 + $0x310] sm:$0xff]  ;;  %v270_v39 = vld [vmem:[#allocation6 + $0x100] sm:$0xff] }
  0x6f   : > { %v759_v40 = vpack.c.bf16 %v273_v33, %v271_v32  ;;  %v272_v41 = vld [vmem:[#allocation6 + $0x110] sm:$0xff]  ;;  %v340_v42 = vld [vmem:[#allocation6 + $0x328] sm:$0xff]  ;;  %v342_v43 = vld [vmem:[#allocation6 + $0x338] sm:$0xff]  ;;  %v697_v46 = vpack.c.bf16 %v337_v38, %v335_v37 }
  0x70   : > { %686 = vmatpush1.bf16.msra.mxu1 %v685_v10  ;;  %v275_v44 = vld [vmem:[#allocation6 + $0x128] sm:$0xff]  ;;  %v277_v45 = vld [vmem:[#allocation6 + $0x138] sm:$0xff]  ;;  %v761_v47 = vpack.c.bf16 %v272_v41, %v270_v39  ;;  %v699_v48 = vpack.c.bf16 %v342_v43, %v340_v42  ;;  %v339_v49 = vld [vmem:[#allocation6 + $0x320] sm:$0xff] }
  0x71   : > { %750 = vmatpush1.bf16.msra.mxu0 %v749_v11  ;;  %688 = vmatprep.subr.bf16.mxu1 %v687_v12  ;;  %v341_v50 = vld [vmem:[#allocation6 + $0x330] sm:$0xff]  ;;  %v274_v51 = vld [vmem:[#allocation6 + $0x120] sm:$0xff]  ;;  %v763_v52 = vpack.c.bf16 %v277_v45, %v275_v44  ;;  %v344_v54 = vld [vmem:[#allocation6 + $0x348] sm:$0xff] }
  0x72   : > { %752 = vmatprep.subr.bf16.mxu0 %v751_v16  ;;  %v276_v53 = vld [vmem:[#allocation6 + $0x130] sm:$0xff]  ;;  %v346_v55 = vld [vmem:[#allocation6 + $0x358] sm:$0xff]  ;;  %v279_v56 = vld [vmem:[#allocation6 + $0x148] sm:$0xff]  ;;  %v701_v58 = vpack.c.bf16 %v341_v50, %v339_v49 }
  0x73   : > { %v281_v57 = vld [vmem:[#allocation6 + $0x158] sm:$0xff]  ;;  %v765_v59 = vpack.c.bf16 %v276_v53, %v274_v51  ;;  %v703_v60 = vpack.c.bf16 %v346_v55, %v344_v54  ;;  %v343_v61 = vld [vmem:[#allocation6 + $0x340] sm:$0xff]  ;;  %v345_v62 = vld [vmem:[#allocation6 + $0x350] sm:$0xff] }
  0x74   : > { %690 = vmatpush1.bf16.msra.mxu1 %v689_v22  ;;  %v278_v63 = vld [vmem:[#allocation6 + $0x140] sm:$0xff]  ;;  %v767_v0 = vpack.c.bf16 %v281_v57, %v279_v56  ;;  %v280_v1 = vld [vmem:[#allocation6 + $0x150] sm:$0xff]  ;;  %v348_v2 = vld [vmem:[#allocation6 + $0x368] sm:$0xff]  ;;  %v705_v6 = vpack.c.bf16 %v345_v62, %v343_v61 }
  0x75   : > { %754 = vmatpush1.bf16.msra.mxu0 %v753_v23  ;;  %692 = vmatprep.subr.bf16.mxu1 %v691_v24  ;;  %v350_v3 = vld [vmem:[#allocation6 + $0x378] sm:$0xff]  ;;  %v283_v4 = vld [vmem:[#allocation6 + $0x168] sm:$0xff]  ;;  %v347_v7 = vld [vmem:[#allocation6 + $0x360] sm:$0xff]  ;;  %v769_v8 = vpack.c.bf16 %v280_v1, %v278_v63 }
  0x76   : > { %756 = vmatprep.subr.bf16.mxu0 %v755_v28  ;;  %v285_v5 = vld [vmem:[#allocation6 + $0x178] sm:$0xff]  ;;  %v707_v9 = vpack.c.bf16 %v350_v3, %v348_v2  ;;  %v349_v10 = vld [vmem:[#allocation6 + $0x370] sm:$0xff]  ;;  %v282_v11 = vld [vmem:[#allocation6 + $0x160] sm:$0xff] }
  0x77   : > { %v284_v12 = vld [vmem:[#allocation6 + $0x170] sm:$0xff]  ;;  %v771_v13 = vpack.c.bf16 %v285_v5, %v283_v4  ;;  %v352_v14 = vld [vmem:[#allocation6 + $0x388] sm:$0xff]  ;;  %v354_v15 = vld [vmem:[#allocation6 + $0x398] sm:$0xff]  ;;  %v709_v22 = vpack.c.bf16 %v349_v10, %v347_v7 }
  0x78   : > { %694 = vmatpush1.bf16.msra.mxu1 %v693_v34  ;;  %v203_v16 = vld [vmem:[%s1161_s6] sm:$0xff]  ;;  %v287_v17 = vld [vmem:[#allocation6 + $0x188] sm:$0xff]  ;;  %v351_v23 = vld [vmem:[#allocation6 + $0x380] sm:$0xff]  ;;  %v773_v27 = vpack.c.bf16 %v284_v12, %v282_v11  ;;  %v711_v28 = vpack.c.bf16 %v354_v15, %v352_v14 }
  0x79   : > { %758 = vmatpush1.bf16.msra.mxu0 %v757_v35  ;;  %696 = vmatprep.subr.bf16.mxu1 %v695_v36  ;;  %v289_v18 = vld [vmem:[#allocation6 + $0x198] sm:$0xff]  ;;  %v205_v19 = vcombine.high %v203_v16, %v203_v16  ;;  %v222_v20 = vsel %vm207_vm0, %v203_v16, 0.0  ;;  %v208_v21 = vsel %vm207_vm0, %v203_v16, -inf  ;;  %v353_v24 = vld [vmem:[#allocation6 + $0x390] sm:$0xff]  ;;  %v286_v29 = vld [vmem:[#allocation6 + $0x180] sm:$0xff] }
  0x7a   : > { %760 = vmatprep.subr.bf16.mxu0 %v759_v40  ;;  %v223_v25 = vrot.slane %v222_v20, 4  ;;  %v209_v26 = vrot.slane %v208_v21, 4  ;;  %v775_v32 = vpack.c.bf16 %v289_v18, %v287_v17  ;;  %v288_v33 = vld [vmem:[#allocation6 + $0x190] sm:$0xff]  ;;  %v356_v34 = vld [vmem:[#allocation6 + $0x3a8] sm:$0xff]  ;;  %v358_v35 = vld [vmem:[#allocation6 + $0x3b8] sm:$0xff]  ;;  %v713_v39 = vpack.c.bf16 %v353_v24, %v351_v23 }
  0x7b   : > { %v229_v30 = vsel %vm207_vm0, %v205_v19, 0.0  ;;  %v215_v31 = vsel %vm207_vm0, %v205_v19, -inf  ;;  %v291_v40 = vld [vmem:[#allocation6 + $0x1a8] sm:$0xff]  ;;  %v293_v41 = vld [vmem:[#allocation6 + $0x1b8] sm:$0xff]  ;;  %v357_v49 = vld [vmem:[#allocation6 + $0x3b0] sm:$0xff] }
  0x7c   : > { %698 = vmatpush1.bf16.msra.mxu1 %v697_v46  ;;  %v230_v36 = vrot.slane %v229_v30, 4  ;;  %v216_v37 = vrot.slane %v215_v31, 4  ;;  %v224_v38 = vadd.f32 %v223_v25, %v222_v20  ;;  %v210_v45 = vmax.f32 %v208_v21, %v209_v26  ;;  %v290_v50 = vld [vmem:[#allocation6 + $0x1a0] sm:$0xff]  ;;  %v360_v53 = vld [vmem:[#allocation6 + $0x3c8] sm:$0xff]  ;;  %v362_v54 = vld [vmem:[#allocation6 + $0x3d8] sm:$0xff] }
  0x7d   : > { %762 = vmatpush1.bf16.msra.mxu0 %v761_v47  ;;  %700 = vmatprep.subr.bf16.mxu1 %v699_v48  ;;  %v777_v46 = vpack.c.bf16 %v288_v33, %v286_v29  ;;  %v715_v47 = vpack.c.bf16 %v358_v35, %v356_v34  ;;  %v355_v48 = vld [vmem:[#allocation6 + $0x3a0] sm:$0xff]  ;;  %v779_v51 = vpack.c.bf16 %v293_v41, %v291_v40  ;;  %v295_v57 = vld [vmem:[#allocation6 + $0x1c8] sm:$0xff]  ;;  %v361_v3 = vld [vmem:[#allocation6 + $0x3d0] sm:$0xff]  ;;  %v510_v34 = vstv %s509_s19 }
  0x7e   : > { %764 = vmatprep.subr.bf16.mxu0 %v763_v52  ;;  %v231_v42 = vadd.f32 %v230_v36, %v229_v30  ;;  %v217_v43 = vmax.f32 %v215_v31, %v216_v37  ;;  %v225_v44 = vrot.slane %v224_v38, 2  ;;  %v292_v52 = vld [vmem:[#allocation6 + $0x1b0] sm:$0xff]  ;;  %v211_v63 = vrot.slane %v210_v45, 2  ;;  %v359_v2 = vld [vmem:[#allocation6 + $0x3c0] sm:$0xff]  ;;  %v364_v7 = vld [vmem:[#allocation6 + $0x3e8] sm:$0xff] }
  0x7f   : > { %v719_v1 = vpack.c.bf16 %v362_v54, %v360_v53  ;;  %v294_v4 = vld [vmem:[#allocation6 + $0x1c0] sm:$0xff]  ;;  %v299_v11 = vld [vmem:[#allocation6 + $0x1e8] sm:$0xff]  ;;  %v301_v12 = vld [vmem:[#allocation6 + $0x1f8] sm:$0xff]  ;;  %v721_v14 = vpack.c.bf16 %v361_v3, %v359_v2 }
  0x80   : > { %702 = vmatpush1.bf16.msra.mxu1 %v701_v58  ;;  %v232_v55 = vrot.slane %v231_v42, 2  ;;  %v218_v56 = vrot.slane %v217_v43, 2  ;;  %v297_v58 = vld [vmem:[#allocation6 + $0x1d8] sm:$0xff]  ;;  %v212_v17 = vmax.f32 %v210_v45, %v211_v63  ;;  %v363_v20 = vld [vmem:[#allocation6 + $0x3e0] sm:$0xff]  ;;  %v365_v21 = vld [vmem:[#allocation6 + $0x3f0] sm:$0xff] }
  0x81   : > { %766 = vmatpush1.bf16.msra.mxu0 %v765_v59  ;;  %704 = vmatprep.subr.bf16.mxu1 %v703_v60  ;;  %v226_v59 = vadd.f32 %v225_v44, %v224_v38  ;;  %v717_v60 = vpack.c.bf16 %v357_v49, %v355_v48  ;;  %v783_v5 = vpack.c.bf16 %v297_v58, %v295_v57  ;;  %v298_v23 = vld [vmem:[#allocation6 + $0x1e0] sm:$0xff]  ;;  %v300_v24 = vld [vmem:[#allocation6 + $0x1f0] sm:$0xff]  ;;  %v531_v49 = vlaneseq }
  0x82   : > { %768 = vmatprep.subr.bf16.mxu0 %v767_v0  ;;  %v233_v61 = vadd.f32 %v232_v55, %v231_v42  ;;  %v219_v62 = vmax.f32 %v217_v43, %v218_v56  ;;  %v781_v0 = vpack.c.bf16 %v292_v52, %v290_v50  ;;  %v789_v29 = vpack.c.bf16 %v300_v24, %v298_v23 }
  0x83   : > { %vm545_vm1 = vcmp.lt.s32.totalorder %v531_v49, 256 }
  0x84   : > { %706 = vmatpush1.bf16.msra.mxu1 %v705_v6  ;;  %v296_v6 = vld [vmem:[#allocation6 + $0x1d0] sm:$0xff]  ;;  %v220_v10 = vrot.slane %v219_v62, 1 }
  0x85   : > { %770 = vmatpush1.bf16.msra.mxu0 %v769_v8  ;;  %708 = vmatprep.subr.bf16.mxu1 %v707_v9  ;;  %v366_v8 = vld [vmem:[#allocation6 + $0x3f8] sm:$0xff]  ;;  %v234_v9 = vrot.slane %v233_v61, 1  ;;  %v785_v18 = vpack.c.bf16 %v296_v6, %v294_v4 }
  0x86   : > { %772 = vmatprep.subr.bf16.mxu0 %v771_v13  ;;  %v227_v13 = vrot.slane %v226_v59, 1  ;;  %v221_v16 = vmax.f32 %v219_v62, %v220_v10  ;;  %v723_v19 = vpack.c.bf16 %v366_v8, %v364_v7 }
  0x87   : > { %v235_v15 = vadd.f32 %v234_v9, %v233_v61 }
  0x88   : > { %710 = vmatpush1.bf16.msra.mxu1 %v709_v22  ;;  %v787_v22 = vpack.c.bf16 %v301_v12, %v299_v11  ;;  %502 = vmatprep.mubr.f32.mxu0 %v221_v16  ;;  %v228_v26 = vadd.f32 %v227_v13, %v226_v59 }
  0x89   : > { %774 = vmatpush1.bf16.msra.mxu0 %v773_v27  ;;  %712 = vmatprep.subr.bf16.mxu1 %v711_v28  ;;  %v237_v25 = vmul.f32 0.25, %v235_v15  ;;  %v725_v27 = vpack.c.bf16 %v365_v21, %v363_v20  ;;  %v213_v28 = vrot.slane %v212_v17, 1 }
  0x8a   : > { %776 = vmatprep.subr.bf16.mxu0 %v775_v32  ;;  %v236_v30 = vmul.f32 0.25, %v228_v26 }
  0x8b   : > { %431 = vmatprep.mubr.f32.mxu1 %v237_v25  ;;  %v214_v31 = vmax.f32 %v212_v17, %v213_v28 }
  0x8c   : > { %714 = vmatpush1.bf16.msra.mxu1 %v713_v39 }
  0x8d   : > { %778 = vmatpush1.bf16.msra.mxu0 %v777_v46  ;;  %716 = vmatprep.subr.bf16.mxu1 %v715_v47  ;;  %v996_v47 = vmov 1966171168  }
  0x8e   : > { %780 = vmatprep.subr.bf16.mxu0 %v779_v51  ;;  %v529_v48 = vunpack.c.l.s4 %v996_v47  ;;  %v532_v51 = vshrl.u32 %v531_v49, 7 }
  0x90   : > { %718 = vmatpush1.bf16.msra.mxu1 %v717_v60  ;;  %v530_v50 = vunpack.c.0.s8 %v529_v48 }
  0x91   : > { %782 = vmatpush1.bf16.msra.mxu0 %v781_v0  ;;  %720 = vmatprep.subr.bf16.mxu1 %v719_v1 }
  0x92   : > { %784 = vmatprep.subr.bf16.mxu0 %v783_v5  ;;  %v533_v53 = vsub.s32 %v530_v50, %v532_v51 }
  0x94   : > { %722 = vmatpush1.bf16.msra.mxu1 %v721_v14 }
  0x95   : > { %786 = vmatpush1.bf16.msra.mxu0 %v785_v18  ;;  %724 = vmatprep.subr.bf16.mxu1 %v723_v19 }
  0x96   : > { %788 = vmatprep.subr.bf16.mxu0 %v787_v22 }
  0x98   : > { %726 = vmatpush1.bf16.msra.mxu1 %v725_v27 }
  0x99   : > { %790 = vmatpush1.bf16.msra.mxu0 %v789_v29 }
  0x9b   : > { %432 = vmatmul.mubr.f32.vlgmr.msra.gmra.mrb[0].mxu1 %v236_v30 }
  0x9c   : > { %503 = vmatmul.mubr.f32.vlgmr.msra.gmra.mrb[0].mxu0 %v214_v31 }
 0x16e   : > { %v433_v32 = vpop.f32.mrb[0].mxu1 }
 0x16f   : > { %v504_v33 = vpop.f32.mrb[0].mxu0  ;;  %v435_v35 = vpop.f32.mrb[1].mxu1 }
 0x170   : > { %v505_v36 = vadd.f32 %v504_v33, %v433_v32  ;;  %v506_v37 = vpop.f32.mrb[1].mxu0 }
 0x171   : > { %v507_v38 = vadd.f32 %v506_v37, %v435_v35 }
 0x172   : > { %v511_v39 = vadd.f32 %v510_v34, %v505_v36 }
 0x173   : > { %v512_v40 = vadd.f32 %v510_v34, %v507_v38 }
 0x174   : > { %v654_v41 = vmul.f32 -1.442695, %v511_v39 }
 0x175   : > { %v655_v42 = vmul.f32 -1.442695, %v512_v40 }
 0x176   : > { %854 = vpow2.f32 %v654_v41 }
 0x177   : > { %856 = vpow2.f32 %v655_v42 }
 0x180   : > { %v855_v43 = vpop.eup %854 }
 0x181   : > { %v857_v44 = vpop.eup %856  ;;  %v519_v45 = vadd.f32 1.0, %v855_v43 }
 0x182   : > { %v520_v46 = vadd.f32 1.0, %v857_v44 }
 0x183   : > { %858 = vrcp.f32 %v519_v45 }
 0x184   : > { %860 = vrcp.f32 %v520_v46 }
 0x18d   : > { %v859_v52 = vpop.eup %858 }
 0x18e   : > { %v861_v54 = vpop.eup %860 }
 0x18f   : > { %v527_v55 = vcombine.low %v859_v52, %v861_v54 }
 0x191   : > { %v534_v56 = vrot.slane %v527_v55, %v533_v53 }
 0x193   : > { %v541_v57 = vrot.slane %v534_v56, %v533_v53 }
 0x195   : > { %547 = vst.msk [vmem:[%s202_s26] sm:$0x3] %vm545_vm1, %v541_v57 }
 0x196   : > { %933 = shalt.err (!%p930_p7)
}
 0x197   : > { %s934_s22 = scalar_lea.hbm %s1181_s8, 32  ;;  %s938_s24 = scalar_lea.hbm %s1228_s3, 64 }
 0x198   : > { %p935_p9 = scmp.ne.s32.totalorder %s1181_s8, %s934_s22  ;;  %p939_p0 = scmp.lt.u32.totalorder %s1181_s8, %s1228_s3 }
 0x199   : > { %p940_p11 = scmp.lt.u32.totalorder %s938_s24, %s934_s22  ;;  %p942_p4 = scmp.lt.u32.totalorder %s934_s22, %s1181_s8 }
 0x19a   : > { %p936_p2 = pnand %p935_p9, %p1112_p12 }
 0x19b   : > { %p941_p1 = por %p940_p11, %p939_p0 }
 0x19c   : > { %p937_p5 = pneg %p936_p2 }
 0x19d   : > { %p943_p6 = por %p942_p4, %p941_p1 }
 0x19f   : > { %p944_p8 = pnand %p943_p6, %p937_p5 }
 0x1a1   : > { %947 = shalt.err (!%p944_p8)
}
 0x1a2   : > { %799 = dma.vmem_to_hbm [thread:$0]  (%p1112_p12), %s1183_s27, 32, %s1181_s8, %s549_s9  }
 0x1a3 PF: > { %s575_s6 = sand.u32 1, %s978_s14   ;;  %p1243_p10 = scmp.ne.s32.totalorder %s1233_s20, 0 }
 0x1a4   : > { %p1244_p13 = scmp.ge.s32.totalorder %s990_s17, 2  ;;  %s576_s19 = scalar_lea.sflag [#allocation5], %s575_s6 }
 0x1a6   : > { %p810_p3 = pnand %p1244_p13, %p1243_p10 }
 0x1a8   : > { %973 = dma.done.wait (!%p810_p3), %s576_s19, 32  }
 0x1a9   : > { %975 = vsyncadd (!%p810_p3), %s576_s19, 4294967264  ;;  %p18_p7 = scmp.ge.s32.totalorder %s1077_s25, 4   ;;  %s1245_s14 = smov %s982_s15 }
 0x1aa   : > { %s1246_s15 = smov %s986_s16  ;;  %s1247_s16 = smov %s1108_s13 }
 0x1ab   : > { %s1248_s17 = smov %s1077_s25  ;;  %20 = sbr.rel (!%p18_p7) target bundleno = 8 (0x8), region = 82 }
 0x1b2   :  { %581 = vsyncpa [#allocation4], 1 }
 0x1b3   :  { %583 = vsyncpa [#allocation4 + $0x1], 1 }
 0x1b4   :  { %584 = vsyncpa [#allocation7], 1 }
 0x1b5   :  { %585 = vsyncpa [#allocation5], 1 }
 0x1b6   :  { %587 = vsyncpa [#allocation5 + $0x1], 1 }

</bundles_post_ra>
